<compile_context>
chip_gen: v5e
topology: v5e:2x2
jax: 0.10.0
libtpu: 0.0.40
codegen_flags: <defaults>
</compile_context>

<pallas_src>
import functools

import jax
import jax.numpy as jnp
from jax.experimental import pallas as pl
from jax.experimental.pallas import tpu as pltpu


# -----------------------------------------------------------------------------
# Kernel bodies
# -----------------------------------------------------------------------------
def _alias_identity_kernel(x_hbm_ref, o_hbm_ref):
    # The output HBM buffer is aliased to the input buffer, so it already holds
    # the correct bytes: there is nothing to do.  (pltpu.touch(o_hbm_ref) would
    # only be needed to pin ordering against *other* side effects, of which
    # there are none in this kernel.)
    del x_hbm_ref, o_hbm_ref


def _dma_copy_kernel(x_hbm_ref, o_hbm_ref, copy_sems, *, num_chunks):
    # Direct HBM->HBM copy: no VMEM round trip, no TensorCore vld/vst work.
    # A few outstanding DMAs keep the HBM read and write pipes busy.
    total = x_hbm_ref.shape[0]
    chunk = pl.cdiv(total, num_chunks)
    if total >= num_chunks * 256:          # keep chunk boundaries nicely aligned
        chunk = pl.cdiv(chunk, 256) * 256
    copies = []
    start = 0
    for i in range(num_chunks):            # static Python loop (shapes static)
        size = min(chunk, total - start)
        if size <= 0:
            break
        cp = pltpu.make_async_copy(
            x_hbm_ref.at[pl.ds(start, size)],
            o_hbm_ref.at[pl.ds(start, size)],
            copy_sems.at[i],
        )
        cp.start()
        copies.append(cp)
        start += size
    for cp in copies:
        cp.wait()


# -----------------------------------------------------------------------------
# Wrappers
# -----------------------------------------------------------------------------
def _identity_alias(x):
    """Zero-copy identity: output HBM buffer aliases the input buffer."""
    return pl.pallas_call(
        _alias_identity_kernel,
        out_shape=jax.ShapeDtypeStruct(x.shape, x.dtype),
        in_specs=[pl.BlockSpec(memory_space=pl.ANY)],
        out_specs=pl.BlockSpec(memory_space=pl.ANY),
        input_output_aliases={0: 0},
        cost_estimate=pl.CostEstimate(flops=0, transcendentals=0,
                                      bytes_accessed=0),
        compiler_params=pltpu.CompilerParams(has_side_effects=True),
    )(x)


def _identity_copy(x, num_dma_chunks=None):
    """Materialized identity: chunked HBM->HBM DMA into a fresh buffer."""
    flat = x.reshape(-1)                   # contiguous -> bitcast under jit
    total = flat.shape[0]
    nbytes = total * jnp.dtype(x.dtype).itemsize
    if num_dma_chunks is None:
        # 2-4 outstanding DMAs for large tensors; a single DMA when small.
        num_dma_chunks = int(max(1, min(4, nbytes // (1 << 20))))
    num_dma_chunks = int(max(1, min(num_dma_chunks, total)))

    out = pl.pallas_call(
        functools.partial(_dma_copy_kernel, num_chunks=num_dma_chunks),
        out_shape=jax.ShapeDtypeStruct((total,), x.dtype),
        in_specs=[pl.BlockSpec(memory_space=pl.ANY)],
        out_specs=pl.BlockSpec(memory_space=pl.ANY),
        scratch_shapes=[pltpu.SemaphoreType.DMA((num_dma_chunks,))],
        cost_estimate=pl.CostEstimate(flops=0, transcendentals=0,
                                      bytes_accessed=2 * int(nbytes)),
        compiler_params=pltpu.CompilerParams(has_side_effects=True),
    )(flat)
    return out.reshape(x.shape)


def identity_norm(x, embedding=None, *, use_pallas: bool = True,
                  copy: bool = False, num_dma_chunks=None):
    """Pallas implementation of IdentityNorm.forward (exact pass-through).

    use_pallas=False : recommended production path — returns the input object,
                       exactly like the PyTorch module (zero HBM traffic).
    copy=False       : default Pallas path; zero-data-movement aliased kernel.
    copy=True        : benchmarking path; materializes a fresh buffer via
                       chunked HBM->HBM DMA (no VMEM staging).
    """
    if isinstance(x, tuple):
        return x
    assert embedding is None

    if not use_pallas:
        return x

    x = jnp.asarray(x)
    if x.ndim == 0 or x.size == 0:
        return x

    if copy:
        return _identity_copy(x, num_dma_chunks)
    return _identity_alias(x)


if __name__ == "__main__":
    key = jax.random.PRNGKey(0)
    k1, k2, k3 = jax.random.split(key, 3)

    # 1) Shape consistent with a norm over d_model: (batch=2, seq=8, d_model=32).
    #    Default Pallas path: zero-data-movement aliased kernel.
    x = jax.random.normal(k1, (2, 8, 32), dtype=jnp.float32)
    y = jax.block_until_ready(identity_norm(x))
    assert y.shape == x.shape and y.dtype == x.dtype
    assert bool(jnp.array_equal(y, x))

    # Same path under jit (how it runs inside a real model).
    y_jit = jax.block_until_ready(jax.jit(identity_norm)(x))
    assert bool(jnp.array_equal(y_jit, x))

    # 2) Materialized copy: 3 outstanding HBM->HBM DMAs (exact chunks).
    x2 = jax.random.normal(k2, (3, 40, 32), dtype=jnp.float32)     # 3840 elems
    y2 = jax.block_until_ready(identity_norm(x2, copy=True, num_dma_chunks=3))
    assert y2.shape == x2.shape and y2.dtype == x2.dtype
    assert bool(jnp.array_equal(y2, x2))

    # 3) Awkward (non-128-divisible) bf16 shape: chunked DMA with a ragged
    #    final chunk — no masked-store / lane-density penalty since no VMEM tile.
    x3 = jax.random.normal(k3, (2, 5, 7), dtype=jnp.bfloat16)      # 70 elems
    y3 = jax.block_until_ready(identity_norm(x3, copy=True, num_dma_chunks=4))
    assert y3.dtype == x3.dtype
    assert bool(jnp.array_equal(y3, x3))

    # 4) Tuple pass-through and the zero-cost production path (matches PyTorch).
    t = (x, x2)
    assert identity_norm(t) is t
    assert identity_norm(x, use_pallas=False) is x

    print("KERNEL_OK")
</pallas_src>

<mosaic_0001>
module attributes {stable_mosaic.version = 11 : i64} {
  func.func @_alias_identity_kernel(%arg0: memref<2x8x32xf32, #tpu.memory_space<any>>, %arg1: memref<2x8x32xf32, #tpu.memory_space<any>>) attributes {dimension_semantics = [], scalar_prefetch = 0 : i64, scratch_operands = 0 : i64, tpu.core_type = #tpu.core_type<tc>} {
    return
  }
}

</mosaic_0001>

<bundles_post_ra>
// kernel: tpu_custom_call.1
= control target key start
LH: loop header
LB: loop body
LE: loop exit
PB: predicated region body
PF: predicated region fallthrough
CT: control target
= control target key end

     0   :  { %s16_s0 = inlined_call_operand.hbm [shape: f32[2,8,32], index: 0, kind: input, shape index: {}, may-alias: {0,1}]   ;;  %s17_s1 = inlined_call_operand.hbm [shape: f32[2,8,32], index: 1, kind: output, shape index: {}, may-alias: {0,1}]  }

</bundles_post_ra>
